<compile_context>
chip_gen: v5e
topology: v5e:2x2
jax: 0.10.0
libtpu: 0.0.40
codegen_flags: <defaults>
</compile_context>

<pallas_src>
import functools
import math

import numpy as np

import jax
import jax.numpy as jnp
from jax import lax
from jax.experimental import pallas as pl
from jax.experimental.pallas import tpu as pltpu

_LN_EPS = 1e-5
_LANE = 128
_SUBLANE = 8


def _round_up(x, m):
    return ((x + m - 1) // m) * m


# ----------------------------- in-kernel helpers -----------------------------
def _layernorm(x, gamma, beta):
    # x: (rows, D); gamma/beta: (1, D). PyTorch LayerNorm (biased variance).
    mu = jnp.mean(x, axis=-1, keepdims=True)
    xc = x - mu
    var = jnp.mean(xc * xc, axis=-1, keepdims=True)
    return xc * lax.rsqrt(var + _LN_EPS) * gamma + beta


def _class_head(pooled, w_ref, D, P, Cp):
    """pooled: (B, D) -> logits (B, Cp).  LN -> Linear -> ReLU -> Linear."""
    g_h = w_ref[D + 1:D + 2, 2 * P:2 * P + D]
    b_h = w_ref[D + 1:D + 2, 3 * P:3 * P + D]
    w1 = w_ref[0:D, 4 * P:4 * P + D]
    b1 = w_ref[D:D + 1, 4 * P:4 * P + D]
    w2 = w_ref[0:D, 5 * P:5 * P + Cp]
    b2 = w_ref[D:D + 1, 5 * P:5 * P + Cp]
    h = _layernorm(pooled, g_h, b_h)
    h = jnp.dot(h, w1, preferred_element_type=jnp.float32) + b1
    h = jnp.maximum(h, 0.0)                       # ReLU
    # TODO(synk): Dropout(0.1) is identity in eval/inference mode; training-mode
    # stochastic masking is not implemented in the kernel.
    return jnp.dot(h, w2, preferred_element_type=jnp.float32) + b2


def _sum_head_blocks(o, H, BS):
    """(H*BS, D) -> (BS, D): log-depth pairwise tree over the head row-blocks."""
    blocks = [o[h * BS:(h + 1) * BS] for h in range(H)]
    while len(blocks) > 1:
        nxt = [blocks[i] + blocks[i + 1] for i in range(0, len(blocks) - 1, 2)]
        if len(blocks) % 2:
            nxt.append(blocks[-1])
        blocks = nxt
    return blocks[0]


# --------------------------------- kernels -----------------------------------
def _attn_classifier_kernel(x_ref, w_ref, c_ref, out_ref, *, B, H):
    """x_ref: (2*B*S, D) stacked [e; fe].  w_ref: packed parameter slab.
    c_ref: packed trace-time constants (pool matrix | head mask | batch mask)."""
    BS2, D = x_ref.shape
    BS = BS2 // 2
    HB = H * BS
    HBp = _round_up(HB, _SUBLANE)
    P = _round_up(D, _LANE)                       # lane-aligned weight panel width
    Cp = w_ref.shape[1] - 5 * P                   # padded class panel width

    x = x_ref[...]                                # (2*BS, D)

    # --- pre-attention LayerNorm, one pass over the stacked [e; fe] block ----
    g_pre = w_ref[D + 1:D + 2, 0:D]
    b_pre = w_ref[D + 1:D + 2, P:P + D]
    xn = _layernorm(x, g_pre, b_pre)

    # --- fused QKV projection: one (2*BS, D) @ (D, 3*P) MXU push + bias row ---
    proj = jnp.dot(xn, w_ref[0:D, 0:3 * P],
                   preferred_element_type=jnp.float32) + w_ref[D:D + 1, 0:3 * P]
    q = proj[0:BS, 0:D]                # query stream = LN(e); 1/sqrt(dh) in packed Wq
    k = proj[BS:BS2, P:P + D]          # key   stream = LN(fe)
    v = proj[BS:BS2, 2 * P:2 * P + D]  # value stream = LN(fe)

    # --- trace-time constants (no iota/div/select chains inside the kernel) ---
    off_h = _round_up(B, _SUBLANE)
    off_b = off_h + HBp
    pool = c_ref[0:B, 0:BS]                       # (B, BS)  per-batch mean pooling
    hmask = c_ref[off_h:off_h + HB, 0:D]          # (HB, D)  0/1 head-lane mask
    bdmask = c_ref[off_b:off_b + HB, 0:BS]        # (HB, BS) additive batch mask

    # --- batched multi-head attention via head-lane masks ---------------------
    # Row r of the (HB, *) arrays is (head = r // BS, query = r % BS).
    qm = jnp.concatenate([q] * H, axis=0) * hmask                       # (HB, D)
    scores = lax.dot_general(qm, k, (((1,), (1,)), ((), ())),
                             preferred_element_type=jnp.float32) + bdmask
    scores = scores - jnp.max(scores, axis=-1, keepdims=True)
    p = jnp.exp(scores)
    p = p * pl.reciprocal(jnp.sum(p, axis=-1, keepdims=True), approx=True)

    o = jnp.dot(p, v, preferred_element_type=jnp.float32) * hmask       # (HB, D)
    attn = _sum_head_blocks(o, H, BS)             # (BS, D) multi-head concat

    wo = w_ref[0:D, 3 * P:3 * P + D]
    bo = w_ref[D:D + 1, 3 * P:3 * P + D]
    attn = jnp.dot(attn, wo, preferred_element_type=jnp.float32) + bo

    e_res = x[0:BS] + attn                        # residual connection
    pooled = jnp.dot(pool, e_res, preferred_element_type=jnp.float32)   # (B, D)
    out_ref[...] = _class_head(pooled, w_ref, D, P, Cp)


def _head_only_kernel(e_ref, w_ref, c_ref, out_ref, *, B):
    BS, D = e_ref.shape
    P = _round_up(D, _LANE)
    Cp = w_ref.shape[1] - 5 * P
    pool = c_ref[0:B, 0:BS]
    pooled = jnp.dot(pool, e_ref[...], preferred_element_type=jnp.float32)   # (B, D)
    out_ref[...] = _class_head(pooled, w_ref, D, P, Cp)


# ------------------------------- module wrapper -------------------------------
def _xavier_uniform(key, shape):
    fan_out, fan_in = shape            # PyTorch Linear weight layout: (out, in)
    bound = math.sqrt(6.0 / (fan_in + fan_out))
    return jax.random.uniform(key, shape, jnp.float32, -bound, bound)


class ClassifierPredictorPallas:
    def __init__(self, num_classes, embedding_dim, threshold=0.5, num_heads=8, seed=0):
        assert embedding_dim % num_heads == 0
        self.num_classes = num_classes
        self.embedding_dim = embedding_dim
        self.threshold = threshold
        self.num_heads = num_heads

        d, c = embedding_dim, num_classes
        dh = d // num_heads
        keys = jax.random.split(jax.random.PRNGKey(seed), 4)

        # MultiheadAttention in_proj / out_proj (xavier), zero biases.
        in_proj = _xavier_uniform(keys[0], (3 * d, d))       # (3D, D), PyTorch layout
        wq, wk, wv = in_proj[:d], in_proj[d:2 * d], in_proj[2 * d:]
        wo = _xavier_uniform(keys[1], (d, d))
        w1 = _xavier_uniform(keys[2], (d, d))
        w2 = _xavier_uniform(keys[3], (c, d))

        f32 = jnp.float32
        zd = jnp.zeros((d,), f32)
        # Un-packed params kept for the pure-JAX reference ((in, out) layout).
        self.ref_params = dict(
            g_pre=jnp.ones((d,), f32), b_pre=zd,
            wq=wq.T, wk=wk.T, wv=wv.T, bq=zd, bk=zd, bv=zd,
            wo=wo.T, bo=zd,
            g_h=jnp.ones((d,), f32), b_h=zd,
            w1=w1.T, b1=zd, w2=w2.T, b2=jnp.zeros((c,), f32),
        )
        p = {k: np.asarray(v) for k, v in self.ref_params.items()}

        # ------------- one lane-aligned parameter slab (single DMA) -----------
        # Lane panels, each starting at a multiple of 128:
        #   [0:P)=Wq*scale  [P:2P)=Wk  [2P:3P)=Wv  [3P:4P)=Wo  [4P:5P)=W1
        #   [5P:5P+Cp)=W2
        # Row D   : bq*scale | bk | bv | bo | b1 | b2
        # Row D+1 : g_pre    | b_pre | g_h | b_h
        P = _round_up(d, _LANE)
        Cp = _round_up(max(c, 1), _LANE)
        rows = _round_up(d + 2, _SUBLANE)
        scale = 1.0 / math.sqrt(dh)
        slab = np.zeros((rows, 5 * P + Cp), np.float32)
        slab[0:d, 0:d] = p["wq"] * scale                   # fold 1/sqrt(dh) into Wq
        slab[0:d, P:P + d] = p["wk"]
        slab[0:d, 2 * P:2 * P + d] = p["wv"]
        slab[0:d, 3 * P:3 * P + d] = p["wo"]
        slab[0:d, 4 * P:4 * P + d] = p["w1"]
        slab[0:d, 5 * P:5 * P + c] = p["w2"]
        slab[d, 0:d] = p["bq"] * scale
        slab[d, P:P + d] = p["bk"]
        slab[d, 2 * P:2 * P + d] = p["bv"]
        slab[d, 3 * P:3 * P + d] = p["bo"]
        slab[d, 4 * P:4 * P + d] = p["b1"]
        slab[d, 5 * P:5 * P + c] = p["b2"]
        slab[d + 1, 0:d] = p["g_pre"]
        slab[d + 1, P:P + d] = p["b_pre"]
        slab[d + 1, 2 * P:2 * P + d] = p["g_h"]
        slab[d + 1, 3 * P:3 * P + d] = p["b_h"]
        self.w_slab = jnp.asarray(slab)
        self.cpad = Cp

        self._const_cache = {}

    # ------------------ packed trace-time constants (cached) ------------------
    def _get_consts(self, b, s):
        """Pool matrix | head-lane mask | block-diagonal batch mask packed into
        one operand; built with numpy at trace time, cached per (B, S)."""
        key = (b, s)
        if key not in self._const_cache:
            d, h = self.embedding_dim, self.num_heads
            dh = d // h
            bs = b * s
            hb = h * bs
            hbp = _round_up(hb, _SUBLANE)
            off_h = _round_up(b, _SUBLANE)
            off_b = off_h + hbp
            wc = max(d, bs)
            cst = np.zeros((off_b + hbp, wc), np.float32)
            # rows [0:B): per-batch mean pooling  P[i, r] = 1/S iff r // S == i
            for i in range(b):
                cst[i, i * s:(i + 1) * s] = 1.0 / s
            # rows [off_h : off_h+hb): 0/1 head-lane mask (row = head*BS + query)
            head_of_row = np.arange(hb)[:, None] // bs
            head_of_lane = np.arange(d)[None, :] // dh
            cst[off_h:off_h + hb, 0:d] = (head_of_row == head_of_lane)
            # rows [off_b : off_b+hb): additive block-diagonal batch mask
            qb = (np.arange(hb)[:, None] % bs) // s
            kb = np.arange(bs)[None, :] // s
            cst[off_b:off_b + hb, 0:bs] = np.where(qb == kb, 0.0, -1e30)
            self._const_cache[key] = jnp.asarray(cst)
        return self._const_cache[key]

    # ----------------------------- forward ------------------------------------
    def __call__(self, e_out, fe=None):
        b, s, d = e_out.shape
        assert d == self.embedding_dim
        bs = b * s
        consts = self._get_consts(b, s)
        vmem = pl.BlockSpec(memory_space=pltpu.MemorySpace.VMEM)
        out_shape = jax.ShapeDtypeStruct((b, self.cpad), jnp.float32)

        # Grid-free call: whole arrays resident in VMEM, no pipelining overhead.
        # TODO(synk): for large B*S on v7x, split the batch over a leading
        # "parallel" grid axis (per-batch score matrices) to use both TensorCores.
        e_flat = e_out.reshape(bs, d)
        if fe is None:
            logits = pl.pallas_call(
                functools.partial(_head_only_kernel, B=b),
                out_shape=out_shape,
                in_specs=[vmem, vmem, vmem],
                out_specs=vmem,
            )(e_flat, self.w_slab, consts)
        else:
            # Stack [e; fe] in the wrapper: one activation DMA, no in-kernel copy.
            x = jnp.concatenate([e_flat, fe.reshape(bs, d)], axis=0)
            logits = pl.pallas_call(
                functools.partial(_attn_classifier_kernel, B=b, H=self.num_heads),
                out_shape=out_shape,
                in_specs=[vmem, vmem, vmem],
                out_specs=vmem,
            )(x, self.w_slab, consts)

        return logits[:, :self.num_classes]               # (B, num_classes)

    # ---------------------- pure-JAX reference (for checking) -----------------
    def reference(self, e_out, fe=None):
        p = self.ref_params
        d, h = self.embedding_dim, self.num_heads
        dh = d // h

        def ln(x, g, bta):
            mu = jnp.mean(x, axis=-1, keepdims=True)
            var = jnp.mean((x - mu) ** 2, axis=-1, keepdims=True)
            return (x - mu) / jnp.sqrt(var + _LN_EPS) * g + bta

        if fe is not None:
            ne, nf = ln(e_out, p["g_pre"], p["b_pre"]), ln(fe, p["g_pre"], p["b_pre"])
            q = ne @ p["wq"] + p["bq"]
            k = nf @ p["wk"] + p["bk"]
            v = nf @ p["wv"] + p["bv"]
            B, S, _ = q.shape
            qh = q.reshape(B, S, h, dh).transpose(0, 2, 1, 3)
            kh = k.reshape(B, S, h, dh).transpose(0, 2, 1, 3)
            vh = v.reshape(B, S, h, dh).transpose(0, 2, 1, 3)
            sc = jnp.einsum("bhqd,bhkd->bhqk", qh, kh) / math.sqrt(dh)
            a = jax.nn.softmax(sc, axis=-1)
            o = jnp.einsum("bhqk,bhkd->bhqd", a, vh).transpose(0, 2, 1, 3).reshape(B, S, d)
            e_out = e_out + (o @ p["wo"] + p["bo"])
        pooled = jnp.mean(e_out, axis=1)
        hdd = jnp.maximum(ln(pooled, p["g_h"], p["b_h"]) @ p["w1"] + p["b1"], 0.0)
        return hdd @ p["w2"] + p["b2"]


# ----------------------------------- main -------------------------------------
if __name__ == "__main__":
    B, S, D = 2, 8, 32
    NUM_CLASSES, NUM_HEADS = 6, 8

    key = jax.random.PRNGKey(0)
    k_e, k_f = jax.random.split(key)
    e_out = jax.random.normal(k_e, (B, S, D), jnp.float32)
    fe = jax.random.normal(k_f, (B, S, D), jnp.float32)

    model = ClassifierPredictorPallas(NUM_CLASSES, D, num_heads=NUM_HEADS, seed=0)

    logits = jax.block_until_ready(model(e_out, fe))
    logits_nofe = jax.block_until_ready(model(e_out, None))

    ref = model.reference(e_out, fe)
    ref_nofe = model.reference(e_out, None)

    assert logits.shape == (B, NUM_CLASSES)
    assert logits_nofe.shape == (B, NUM_CLASSES)
    # tolerance loosened slightly because the softmax denominator uses the
    # approximate (EUP) reciprocal.
    assert jnp.allclose(logits, ref, atol=2e-3, rtol=2e-3), \
        float(jnp.max(jnp.abs(logits - ref)))
    assert jnp.allclose(logits_nofe, ref_nofe, atol=2e-3, rtol=2e-3), \
        float(jnp.max(jnp.abs(logits_nofe - ref_nofe)))

    print("KERNEL_OK")
</pallas_src>

<mosaic_0001>
module attributes {stable_mosaic.version = 11 : i64} {
  func.func @_attn_classifier_kernel(%arg0: memref<32x32xf32, #tpu.memory_space<vmem>>, %arg1: memref<40x768xf32, #tpu.memory_space<vmem>>, %arg2: memref<264x32xf32, #tpu.memory_space<vmem>>, %arg3: memref<2x128xf32, #tpu.memory_space<vmem>>) attributes {dimension_semantics = [], scalar_prefetch = 0 : i64, scratch_operands = 0 : i64, tpu.core_type = #tpu.core_type<tc>} {
    %c0 = arith.constant 0 : index
    %c0_0 = arith.constant 0 : index
    %0 = vector.load %arg0[%c0, %c0_0] : memref<32x32xf32, #tpu.memory_space<vmem>>, vector<32x32xf32>
    %c33 = arith.constant 33 : index
    %c0_1 = arith.constant 0 : index
    %1 = vector.load %arg1[%c33, %c0_1] : memref<40x768xf32, #tpu.memory_space<vmem>>, vector<1x32xf32>
    %c33_2 = arith.constant 33 : index
    %c128 = arith.constant 128 : index
    %2 = vector.load %arg1[%c33_2, %c128] : memref<40x768xf32, #tpu.memory_space<vmem>>, vector<1x32xf32>
    %cst = arith.constant dense<0.000000e+00> : vector<32xf32>
    %3 = vector.multi_reduction <add>, %0, %cst [1] : vector<32x32xf32> to vector<32xf32>
    %4 = vector.shape_cast %3 : vector<32xf32> to vector<32x1xf32>
    %cst_3 = arith.constant 3.200000e+01 : f32
    %5 = vector.broadcast %cst_3 : f32 to vector<32x1xf32>
    %6 = arith.divf %4, %5 : vector<32x1xf32>
    %7 = vector.broadcast %6 : vector<32x1xf32> to vector<32x32xf32>
    %8 = arith.subf %0, %7 : vector<32x32xf32>
    %9 = arith.mulf %8, %8 : vector<32x32xf32>
    %cst_4 = arith.constant dense<0.000000e+00> : vector<32xf32>
    %10 = vector.multi_reduction <add>, %9, %cst_4 [1] : vector<32x32xf32> to vector<32xf32>
    %11 = vector.shape_cast %10 : vector<32xf32> to vector<32x1xf32>
    %cst_5 = arith.constant 3.200000e+01 : f32
    %12 = vector.broadcast %cst_5 : f32 to vector<32x1xf32>
    %13 = arith.divf %11, %12 : vector<32x1xf32>
    %cst_6 = arith.constant 9.99999974E-6 : f32
    %14 = vector.broadcast %cst_6 : f32 to vector<32x1xf32>
    %15 = arith.addf %13, %14 : vector<32x1xf32>
    %16 = math.rsqrt %15 : vector<32x1xf32>
    %17 = vector.broadcast %16 : vector<32x1xf32> to vector<32x32xf32>
    %18 = arith.mulf %8, %17 : vector<32x32xf32>
    %19 = vector.broadcast %1 : vector<1x32xf32> to vector<32x32xf32>
    %20 = arith.mulf %18, %19 : vector<32x32xf32>
    %21 = vector.broadcast %2 : vector<1x32xf32> to vector<32x32xf32>
    %22 = arith.addf %20, %21 : vector<32x32xf32>
    %c0_7 = arith.constant 0 : index
    %c0_8 = arith.constant 0 : index
    %23 = vector.load %arg1[%c0_7, %c0_8] : memref<40x768xf32, #tpu.memory_space<vmem>>, vector<32x384xf32>
    %cst_9 = arith.constant dense<0.000000e+00> : vector<32x384xf32>
    %24 = tpu.matmul %22, %23, %cst_9 {dimension_numbers = #tpu.dot_dimension_numbers<[1], [0], [0], [1], [0, 0, 1, 1], [], []>} : vector<32x32xf32>, vector<32x384xf32>, vector<32x384xf32> -> vector<32x384xf32>
    %c32 = arith.constant 32 : index
    %c0_10 = arith.constant 0 : index
    %25 = vector.load %arg1[%c32, %c0_10] : memref<40x768xf32, #tpu.memory_space<vmem>>, vector<1x384xf32>
    %26 = vector.broadcast %25 : vector<1x384xf32> to vector<32x384xf32>
    %27 = arith.addf %24, %26 : vector<32x384xf32>
    %28 = vector.extract_strided_slice %27 {offsets = [0, 0], sizes = [16, 32], strides = [1, 1]} : vector<32x384xf32> to vector<16x32xf32>
    %29 = vector.extract_strided_slice %27 {offsets = [16, 128], sizes = [16, 32], strides = [1, 1]} : vector<32x384xf32> to vector<16x32xf32>
    %30 = vector.extract_strided_slice %27 {offsets = [16, 256], sizes = [16, 32], strides = [1, 1]} : vector<32x384xf32> to vector<16x32xf32>
    %c0_11 = arith.constant 0 : index
    %c0_12 = arith.constant 0 : index
    %31 = vector.load %arg2[%c0_11, %c0_12] : memref<264x32xf32, #tpu.memory_space<vmem>>, vector<2x16xf32>
    %c8 = arith.constant 8 : index
    %c0_13 = arith.constant 0 : index
    %32 = vector.load %arg2[%c8, %c0_13] : memref<264x32xf32, #tpu.memory_space<vmem>>, vector<128x32xf32>
    %c136 = arith.constant 136 : index
    %c0_14 = arith.constant 0 : index
    %33 = vector.load %arg2[%c136, %c0_14] : memref<264x32xf32, #tpu.memory_space<vmem>>, vector<128x16xf32>
    %34 = tpu.concatenate %28, %28, %28, %28, %28, %28, %28, %28 in 0 : vector<16x32xf32>, vector<16x32xf32>, vector<16x32xf32>, vector<16x32xf32>, vector<16x32xf32>, vector<16x32xf32>, vector<16x32xf32>, vector<16x32xf32> -> vector<128x32xf32>
    %35 = arith.mulf %34, %32 : vector<128x32xf32>
    %cst_15 = arith.constant dense<0.000000e+00> : vector<128x16xf32>
    %36 = tpu.matmul %35, %29, %cst_15 {dimension_numbers = #tpu.dot_dimension_numbers<[1], [1], [0], [0], [0, 0, 1, 0], [], []>} : vector<128x32xf32>, vector<16x32xf32>, vector<128x16xf32> -> vector<128x16xf32>
    %37 = arith.addf %36, %33 : vector<128x16xf32>
    %cst_16 = arith.constant dense<0xFF800000> : vector<128xf32>
    %38 = vector.multi_reduction <maximumf>, %37, %cst_16 [1] : vector<128x16xf32> to vector<128xf32>
    %39 = vector.shape_cast %38 : vector<128xf32> to vector<128x1xf32>
    %40 = vector.broadcast %39 : vector<128x1xf32> to vector<128x16xf32>
    %41 = arith.subf %37, %40 : vector<128x16xf32>
    %42 = math.exp %41 : vector<128x16xf32>
    %cst_17 = arith.constant dense<0.000000e+00> : vector<128xf32>
    %43 = vector.multi_reduction <add>, %42, %cst_17 [1] : vector<128x16xf32> to vector<128xf32>
    %44 = vector.shape_cast %43 : vector<128xf32> to vector<128x1xf32>
    %45 = tpu.reciprocal %44 {approx = true} : vector<128x1xf32> -> vector<128x1xf32>
    %46 = vector.broadcast %45 : vector<128x1xf32> to vector<128x16xf32>
    %47 = arith.mulf %42, %46 : vector<128x16xf32>
    %cst_18 = arith.constant dense<0.000000e+00> : vector<128x32xf32>
    %48 = tpu.matmul %47, %30, %cst_18 {dimension_numbers = #tpu.dot_dimension_numbers<[1], [0], [0], [1], [0, 0, 1, 1], [], []>} : vector<128x16xf32>, vector<16x32xf32>, vector<128x32xf32> -> vector<128x32xf32>
    %49 = arith.mulf %48, %32 : vector<128x32xf32>
    %50 = vector.extract_strided_slice %49 {offsets = [0, 0], sizes = [16, 32], strides = [1, 1]} : vector<128x32xf32> to vector<16x32xf32>
    %51 = vector.extract_strided_slice %49 {offsets = [16, 0], sizes = [16, 32], strides = [1, 1]} : vector<128x32xf32> to vector<16x32xf32>
    %52 = vector.extract_strided_slice %49 {offsets = [32, 0], sizes = [16, 32], strides = [1, 1]} : vector<128x32xf32> to vector<16x32xf32>
    %53 = vector.extract_strided_slice %49 {offsets = [48, 0], sizes = [16, 32], strides = [1, 1]} : vector<128x32xf32> to vector<16x32xf32>
    %54 = vector.extract_strided_slice %49 {offsets = [64, 0], sizes = [16, 32], strides = [1, 1]} : vector<128x32xf32> to vector<16x32xf32>
    %55 = vector.extract_strided_slice %49 {offsets = [80, 0], sizes = [16, 32], strides = [1, 1]} : vector<128x32xf32> to vector<16x32xf32>
    %56 = vector.extract_strided_slice %49 {offsets = [96, 0], sizes = [16, 32], strides = [1, 1]} : vector<128x32xf32> to vector<16x32xf32>
    %57 = vector.extract_strided_slice %49 {offsets = [112, 0], sizes = [16, 32], strides = [1, 1]} : vector<128x32xf32> to vector<16x32xf32>
    %58 = arith.addf %50, %51 : vector<16x32xf32>
    %59 = arith.addf %52, %53 : vector<16x32xf32>
    %60 = arith.addf %54, %55 : vector<16x32xf32>
    %61 = arith.addf %56, %57 : vector<16x32xf32>
    %62 = arith.addf %58, %59 : vector<16x32xf32>
    %63 = arith.addf %60, %61 : vector<16x32xf32>
    %64 = arith.addf %62, %63 : vector<16x32xf32>
    %c0_19 = arith.constant 0 : index
    %c384 = arith.constant 384 : index
    %65 = vector.load %arg1[%c0_19, %c384] : memref<40x768xf32, #tpu.memory_space<vmem>>, vector<32x32xf32>
    %c32_20 = arith.constant 32 : index
    %c384_21 = arith.constant 384 : index
    %66 = vector.load %arg1[%c32_20, %c384_21] : memref<40x768xf32, #tpu.memory_space<vmem>>, vector<1x32xf32>
    %cst_22 = arith.constant dense<0.000000e+00> : vector<16x32xf32>
    %67 = tpu.matmul %64, %65, %cst_22 {dimension_numbers = #tpu.dot_dimension_numbers<[1], [0], [0], [1], [0, 0, 1, 1], [], []>} : vector<16x32xf32>, vector<32x32xf32>, vector<16x32xf32> -> vector<16x32xf32>
    %68 = vector.broadcast %66 : vector<1x32xf32> to vector<16x32xf32>
    %69 = arith.addf %67, %68 : vector<16x32xf32>
    %70 = vector.extract_strided_slice %0 {offsets = [0, 0], sizes = [16, 32], strides = [1, 1]} : vector<32x32xf32> to vector<16x32xf32>
    %71 = arith.addf %70, %69 : vector<16x32xf32>
    %cst_23 = arith.constant dense<0.000000e+00> : vector<2x32xf32>
    %72 = tpu.matmul %31, %71, %cst_23 {dimension_numbers = #tpu.dot_dimension_numbers<[1], [0], [0], [1], [0, 0, 1, 1], [], []>} : vector<2x16xf32>, vector<16x32xf32>, vector<2x32xf32> -> vector<2x32xf32>
    %c33_24 = arith.constant 33 : index
    %c256 = arith.constant 256 : index
    %73 = vector.load %arg1[%c33_24, %c256] : memref<40x768xf32, #tpu.memory_space<vmem>>, vector<1x32xf32>
    %c33_25 = arith.constant 33 : index
    %c384_26 = arith.constant 384 : index
    %74 = vector.load %arg1[%c33_25, %c384_26] : memref<40x768xf32, #tpu.memory_space<vmem>>, vector<1x32xf32>
    %c0_27 = arith.constant 0 : index
    %c512 = arith.constant 512 : index
    %75 = vector.load %arg1[%c0_27, %c512] : memref<40x768xf32, #tpu.memory_space<vmem>>, vector<32x32xf32>
    %c32_28 = arith.constant 32 : index
    %c512_29 = arith.constant 512 : index
    %76 = vector.load %arg1[%c32_28, %c512_29] : memref<40x768xf32, #tpu.memory_space<vmem>>, vector<1x32xf32>
    %c0_30 = arith.constant 0 : index
    %c640 = arith.constant 640 : index
    %77 = vector.load %arg1[%c0_30, %c640] : memref<40x768xf32, #tpu.memory_space<vmem>>, vector<32x128xf32>
    %c32_31 = arith.constant 32 : index
    %c640_32 = arith.constant 640 : index
    %78 = vector.load %arg1[%c32_31, %c640_32] : memref<40x768xf32, #tpu.memory_space<vmem>>, vector<1x128xf32>
    %cst_33 = arith.constant dense<0.000000e+00> : vector<2xf32>
    %79 = vector.multi_reduction <add>, %72, %cst_33 [1] : vector<2x32xf32> to vector<2xf32>
    %80 = vector.shape_cast %79 : vector<2xf32> to vector<2x1xf32>
    %cst_34 = arith.constant 3.200000e+01 : f32
    %81 = vector.broadcast %cst_34 : f32 to vector<2x1xf32>
    %82 = arith.divf %80, %81 : vector<2x1xf32>
    %83 = vector.broadcast %82 : vector<2x1xf32> to vector<2x32xf32>
    %84 = arith.subf %72, %83 : vector<2x32xf32>
    %85 = arith.mulf %84, %84 : vector<2x32xf32>
    %cst_35 = arith.constant dense<0.000000e+00> : vector<2xf32>
    %86 = vector.multi_reduction <add>, %85, %cst_35 [1] : vector<2x32xf32> to vector<2xf32>
    %87 = vector.shape_cast %86 : vector<2xf32> to vector<2x1xf32>
    %cst_36 = arith.constant 3.200000e+01 : f32
    %88 = vector.broadcast %cst_36 : f32 to vector<2x1xf32>
    %89 = arith.divf %87, %88 : vector<2x1xf32>
    %cst_37 = arith.constant 9.99999974E-6 : f32
    %90 = vector.broadcast %cst_37 : f32 to vector<2x1xf32>
    %91 = arith.addf %89, %90 : vector<2x1xf32>
    %92 = math.rsqrt %91 : vector<2x1xf32>
    %93 = vector.broadcast %92 : vector<2x1xf32> to vector<2x32xf32>
    %94 = arith.mulf %84, %93 : vector<2x32xf32>
    %95 = vector.broadcast %73 : vector<1x32xf32> to vector<2x32xf32>
    %96 = arith.mulf %94, %95 : vector<2x32xf32>
    %97 = vector.broadcast %74 : vector<1x32xf32> to vector<2x32xf32>
    %98 = arith.addf %96, %97 : vector<2x32xf32>
    %cst_38 = arith.constant dense<0.000000e+00> : vector<2x32xf32>
    %99 = tpu.matmul %98, %75, %cst_38 {dimension_numbers = #tpu.dot_dimension_numbers<[1], [0], [0], [1], [0, 0, 1, 1], [], []>} : vector<2x32xf32>, vector<32x32xf32>, vector<2x32xf32> -> vector<2x32xf32>
    %100 = vector.broadcast %76 : vector<1x32xf32> to vector<2x32xf32>
    %101 = arith.addf %99, %100 : vector<2x32xf32>
    %cst_39 = arith.constant 0.000000e+00 : f32
    %102 = vector.broadcast %cst_39 : f32 to vector<2x32xf32>
    %103 = arith.maximumf %101, %102 : vector<2x32xf32>
    %cst_40 = arith.constant dense<0.000000e+00> : vector<2x128xf32>
    %104 = tpu.matmul %103, %77, %cst_40 {dimension_numbers = #tpu.dot_dimension_numbers<[1], [0], [0], [1], [0, 0, 1, 1], [], []>} : vector<2x32xf32>, vector<32x128xf32>, vector<2x128xf32> -> vector<2x128xf32>
    %105 = vector.broadcast %78 : vector<1x128xf32> to vector<2x128xf32>
    %106 = arith.addf %104, %105 : vector<2x128xf32>
    %c0_41 = arith.constant 0 : index
    %c0_42 = arith.constant 0 : index
    %107 = vector.load %arg3[%c0_41, %c0_42] : memref<2x128xf32, #tpu.memory_space<vmem>>, vector<2x128xf32>
    tpu.vector_store %arg3[%c0_41, %c0_42], %106 {strides = array<i32>} : memref<2x128xf32, #tpu.memory_space<vmem>>, vector<2x128xf32>,
    return
  }
}

</mosaic_0001>

<bundles_post_ra>
// kernel: tpu_custom_call.1
= control target key start
LH: loop header
LB: loop body
LE: loop exit
PB: predicated region body
PF: predicated region fallthrough
CT: control target
= control target key end

     0   :  { %vm21_vm0 = vcmask 261120   ;;  %s1610_s0 = inlined_call_operand.vmem [shape: f32[32,32], index: 0, kind: input, shape index: {}]   ;;  %s1611_s1 = inlined_call_operand.vmem [shape: f32[40,768], index: 1, kind: input, shape index: {}]   ;;  %s1612_s2 = inlined_call_operand.vmem [shape: f32[264,32], index: 2, kind: input, shape index: {}]   ;;  %s1613_s3 = inlined_call_operand.hbm [shape: f32[2,128], index: 3, kind: output, shape index: {}]  }
   0x1   :  { %v17_v0 = vld [vmem:[%s1610_s0 + $0x10] sm:$0xff]  ;;  %v15_v1 = vld [vmem:[%s1610_s0] sm:$0xff] }
   0x2   :  { %v28_v2 = vsel %vm21_vm0, %v17_v0, 0.0  ;;  %v22_v3 = vsel %vm21_vm0, %v15_v1, 0.0 }
   0x3   :  { %8 = vsyncpa [#allocation3], 0  ;;  %29 = vadd.xlane.f32.xlu1 %v28_v2  ;;  %23 = vadd.xlane.f32.xlu0 %v22_v3  ;;  %v18_v4 = vld [vmem:[%s1610_s0 + $0x18] sm:$0xff]  ;;  %v16_v5 = vld [vmem:[%s1610_s0 + $0x8] sm:$0xff]  ;;  %v1049_v8 = vmov 32.0   ;;  %vm407_vm14 = vcmask 130048  }
   0x4   :  { %v31_v6 = vsel %vm21_vm0, %v18_v4, 0.0  ;;  %v25_v7 = vsel %vm21_vm0, %v16_v5, 0.0  ;;  %945 = vrcp.f32 %v1049_v8  ;;  %v134_v35 = vld [vmem:[%s1611_s1 + $0x90] sm:$0xff]  ;;  %v135_v36 = vld [vmem:[%s1611_s1 + $0x98] sm:$0xff]  ;;  %v136_v37 = vld [vmem:[%s1611_s1 + $0xa0] sm:$0xff]  ;;  %vm798_vm15 = vcmask 254976  }
   0x5   :  { %170 = vmatpush.msra.mxu0 %v134_v35  ;;  %197 = vmatpush.msra.mxu1 %v135_v36  ;;  %v131_v38 = vld [vmem:[%s1611_s1 + $0x60] sm:$0xff]  ;;  %v132_v39 = vld [vmem:[%s1611_s1 + $0x68] sm:$0xff]  ;;  %v133_v40 = vld [vmem:[%s1611_s1 + $0x70] sm:$0xff]  ;;  %s1050_s17 = smov [#allocation2]   ;;  %s878_s21 = sshll.u32 %s1613_s3, 4  ;;  %s879_s21 = int_to_ptr.hbm [resolvable:$true] %s878_s21 }
   0x6   :  { %224 = vmatpush.msra.mxu2 %v136_v37  ;;  %v128_v41 = vld [vmem:[%s1611_s1 + $0x30] sm:$0xff]  ;;  %v129_v42 = vld [vmem:[%s1611_s1 + $0x38] sm:$0xff]  ;;  %v130_v43 = vld [vmem:[%s1611_s1 + $0x40] sm:$0xff]  ;;  %s876_s18 = sshll.u32 %s1050_s17, 4  ;;  %s877_s18 = int_to_ptr.vmem [resolvable:$true] %s876_s18 }
   0x7   :  { %171 = vmatpush.msra.mxu0 %v131_v38  ;;  %198 = vmatpush.msra.mxu1 %v132_v39  ;;  %v125_v44 = vld [vmem:[%s1611_s1] sm:$0xff]  ;;  %v126_v45 = vld [vmem:[%s1611_s1 + $0x8] sm:$0xff]  ;;  %v127_v46 = vld [vmem:[%s1611_s1 + $0x10] sm:$0xff] }
   0x8   :  { %225 = vmatpush.msra.mxu2 %v133_v40 }
   0x9   :  { %172 = vmatpush.msra.mxu0 %v128_v41  ;;  %199 = vmatpush.msra.mxu1 %v129_v42 }
   0xa   :  { %v946_v9 = vpop.eup %945  ;;  %226 = vmatpush.msra.mxu2 %v130_v43 }
   0xb   :  { %32 = vadd.xlane.f32.xlu1 %v31_v6  ;;  %26 = vadd.xlane.f32.xlu0 %v25_v7  ;;  %v35_v10 = vmul.f32 32.0, %v946_v9  ;;  %vm39_vm1 = vweird.f32 %v946_v9 }
   0xc   :  { %173 = vmatpush.msra.mxu0 %v125_v44  ;;  %200 = vmatpush.msra.mxu1 %v126_v45 }
   0xd   :  { %v36_v11 = vsub.f32 1.0, %v35_v10  ;;  %227 = vmatpush.msra.mxu2 %v127_v46  ;;  %v19_v10 = vld [vmem:[%s1611_s1 + $0xc1] ss:$0 sm:$0xff] }
   0xf   :  { %v37_v12 = vmul.f32 %v946_v9, %v36_v11 }
  0x11   :  { %v38_v13 = vadd.f32 %v946_v9, %v37_v12 }
  0x13   :  { %v1087_v14 = vsel %vm39_vm1, %v946_v9, %v38_v13  ;;  %v20_v13 = vld [vmem:[%s1611_s1 + $0xc9] ss:$0 sm:$0xff] }
  0x76   :  { %v30_v15 = vpop.xlane.xlu1 %29  ;;  %v24_v16 = vpop.xlane.xlu0 %23 }
  0x77   :  { %v43_v17 = vmul.f32 %v1087_v14, %v30_v15  ;;  %v41_v18 = vmul.f32 %v1087_v14, %v24_v16 }
  0x79   :  { %v1091_v19 = vsub.f32 %v17_v0, %v43_v17  ;;  %v1093_v20 = vsub.f32 %v15_v1, %v41_v18 }
  0x7b   :  { %v51_v21 = vmul.f32 %v1091_v19, %v1091_v19  ;;  %v49_v22 = vmul.f32 %v1093_v20, %v1093_v20 }
  0x7d   :  { %v59_v23 = vsel %vm21_vm0, %v51_v21, 0.0  ;;  %v53_v24 = vsel %vm21_vm0, %v49_v22, 0.0 }
  0x7e   :  { %v33_v25 = vpop.xlane.xlu1 %32  ;;  %60 = vadd.xlane.f32.xlu0 %v59_v23  ;;  %54 = vadd.xlane.f32.xlu2 %v53_v24  ;;  %v27_v26 = vpop.xlane.xlu0 %26  ;;  %v1275_v24 = vld [vmem:[%s1612_s2 + $0x68] sm:$0xff] }
  0x7f   :  { %v44_v27 = vmul.f32 %v1087_v14, %v33_v25  ;;  %v42_v28 = vmul.f32 %v1087_v14, %v27_v26 }
  0x81   :  { %v1103_v29 = vsub.f32 %v18_v4, %v44_v27  ;;  %v1105_v30 = vsub.f32 %v16_v5, %v42_v28 }
  0x83   :  { %v52_v31 = vmul.f32 %v1103_v29, %v1103_v29  ;;  %v50_v32 = vmul.f32 %v1105_v30, %v1105_v30 }
  0x85   :  { %v62_v33 = vsel %vm21_vm0, %v52_v31, 0.0  ;;  %v56_v34 = vsel %vm21_vm0, %v50_v32, 0.0 }
  0x86   :  { %63 = vadd.xlane.f32.xlu1 %v62_v33  ;;  %57 = vadd.xlane.f32.xlu2 %v56_v34 }
  0xf1   :  { %v55_v47 = vpop.xlane.xlu2 %54  ;;  %v61_v48 = vpop.xlane.xlu0 %60 }
  0xf2   :  { %v65_v49 = vmul.f32 %v55_v47, %v1087_v14  ;;  %v67_v50 = vmul.f32 %v61_v48, %v1087_v14  ;;  %v887_v47 = vld [vmem:[%s1611_s1 + $0xc0] ss:$8 sm:$0x7] }
  0xf3   :  { %v141_v48 = vperm.slane %v887_v47, 1 }
  0xf4   :  { %v69_v51 = vadd.f32 1e-05, %v65_v49  ;;  %v71_v52 = vadd.f32 1e-05, %v67_v50 }
  0xf6   :  { %947 = vrsqrt.f32 %v69_v51  ;;  %vm79_vm3 = vweird.f32 %v69_v51  ;;  %vm99_vm5 = vweird.f32 %v71_v52 }
  0xf7   :  { %949 = vrsqrt.f32 %v71_v52 }
  0xf9   :  { %v64_v53 = vpop.xlane.xlu1 %63  ;;  %v58_v54 = vpop.xlane.xlu2 %57 }
  0xfa   :  { %v68_v55 = vmul.f32 %v64_v53, %v1087_v14  ;;  %v66_v56 = vmul.f32 %v58_v54, %v1087_v14 }
  0xfc   :  { %v948_v57 = vpop.eup %947  ;;  %v72_v58 = vadd.f32 1e-05, %v68_v55  ;;  %v70_v59 = vadd.f32 1e-05, %v66_v56 }
  0xfd   :  { %v950_v60 = vpop.eup %949  ;;  %v74_v61 = vmul.f32 %v948_v57, %v69_v51  ;;  %vm80_vm2 = vweird.f32 %v948_v57 }
  0xfe   :  { %v94_v62 = vmul.f32 %v950_v60, %v71_v52  ;;  %951 = vrsqrt.f32 %v72_v58  ;;  %vm81_vm4 = vmor %vm79_vm3, %vm80_vm2  ;;  %vm100_vm6 = vweird.f32 %v950_v60  ;;  %vm89_vm9 = vweird.f32 %v70_v59 }
  0xff   :  { %v75_v63 = vmul.f32 %v948_v57, %v74_v61  ;;  %953 = vrsqrt.f32 %v70_v59  ;;  %vm1160_vm8 = vmor %vm99_vm5, %vm100_vm6  ;;  %vm109_vm11 = vweird.f32 %v72_v58  ;;  %v140_v52 = vperm.slane %v887_v47, 0 }
 0x100   :  { %v95_v1 = vmul.f32 %v950_v60, %v94_v62 }
 0x101   :  { %v76_v0 = vmul.f32 0.5, %v75_v63 }
 0x102   :  { %v96_v6 = vmul.f32 0.5, %v95_v1  ;;  %v1205_v1 = vld [vmem:[%s1612_s2 + $0x10] sm:$0xff] }
 0x103   :  { %v77_v2 = vsub.f32 1.5, %v76_v0 }
 0x104   :  { %v952_v3 = vpop.eup %951  ;;  %v97_v15 = vsub.f32 1.5, %v96_v6  ;;  %v1224_v6 = vld [vmem:[%s1612_s2 + $0x30] sm:$0xff] }
 0x105   :  { %v954_v4 = vpop.eup %953  ;;  %v78_v5 = vmul.f32 %v948_v57, %v77_v2  ;;  %v104_v7 = vmul.f32 %v952_v3, %v72_v58  ;;  %vm110_vm12 = vweird.f32 %v952_v3  ;;  %v1189_v58 = vld [vmem:[%s1612_s2 + $0x8] sm:$0xff] }
 0x106   :  { %v84_v8 = vmul.f32 %v954_v4, %v70_v59  ;;  %vm90_vm7 = vweird.f32 %v954_v4  ;;  %v98_v23 = vmul.f32 %v950_v60, %v97_v15  ;;  %vm111_vm13 = vmor %vm109_vm11, %vm110_vm12  ;;  %v1194_v59 = vld [vmem:[%s1612_s2 + $0x20] sm:$0xff]  ;;  %v1210_v2 = vld [vmem:[%s1612_s2 + $0x28] sm:$0xff] }
 0x107   :  { %v82_v9 = vsel %vm81_vm4, %v948_v57, %v78_v5  ;;  %v105_v16 = vmul.f32 %v952_v3, %v104_v7  ;;  %vm91_vm10 = vmor %vm89_vm9, %vm90_vm7  ;;  %v142_v57 = vperm.slane %v887_v47, 2  ;;  %v1219_v5 = vld [vmem:[%s1612_s2 + $0x18] sm:$0xff] }
 0x108   :  { %v85_v11 = vmul.f32 %v954_v4, %v84_v8  ;;  %v113_v12 = vmul.f32 %v82_v9, %v1093_v20  ;;  %v102_v28 = vsel %vm1160_vm8, %v950_v60, %v98_v23  ;;  %v1233_v9 = vld [vmem:[%s1612_s2 + $0x38] sm:$0xff] }
 0x109   :  { %v106_v25 = vmul.f32 0.5, %v105_v16  ;;  %v115_v34 = vmul.f32 %v102_v28, %v1091_v19  ;;  %v1254_v16 = vld [vmem:[%s1612_s2 + $0x50] sm:$0xff] }
 0x10a   :  { %v86_v17 = vmul.f32 0.5, %v85_v11  ;;  %v117_v18 = vmul.f32 %v113_v12, %v19_v10  ;;  %v1240_v11 = vld [vmem:[%s1612_s2 + $0x40] sm:$0xff] }
 0x10b   :  { %v107_v31 = vsub.f32 1.5, %v106_v25  ;;  %v119_v36 = vmul.f32 %v115_v34, %v19_v10 }
 0x10c   :  { %v87_v21 = vsub.f32 1.5, %v86_v17  ;;  %v121_v22 = vadd.f32 %v117_v18, %v20_v13  ;;  %v1261_v18 = vld [vmem:[%s1612_s2 + $0x58] sm:$0xff] }
 0x10d   :  { %v108_v35 = vmul.f32 %v952_v3, %v107_v31  ;;  %v123_v37 = vadd.f32 %v119_v36, %v20_v13  ;;  %v1296_v31 = vld [vmem:[%s1612_s2 + $0x80] sm:$0xff] }
 0x10e   :  { %v88_v20 = vmul.f32 %v954_v4, %v87_v21  ;;  %888 = vmatmul.msk.f32.vlgmr.msra.gmra.mxu0 %vm21_vm0, %v121_v22  ;;  %892 = vmatmul.msk.f32.vlgmr.msra.gmra.mxu1 %vm21_vm0, %v121_v22 }
 0x10f   :  { %896 = vmatmul.msk.f32.vlgmr.msra.gmra.mxu2 %vm21_vm0, %v121_v22  ;;  %v1268_v22 = vld [vmem:[%s1612_s2 + $0x60] sm:$0xff] }
 0x110   :  { %v92_v26 = vsel %vm91_vm10, %v954_v4, %v88_v20  ;;  %v1282_v20 = vld [vmem:[%s1612_s2 + $0x70] sm:$0xff] }
 0x111   :  { %v114_v27 = vmul.f32 %v92_v26, %v1105_v30  ;;  %v112_v30 = vsel %vm111_vm13, %v952_v3, %v108_v35 }
 0x112   :  { %v116_v38 = vmul.f32 %v112_v30, %v1103_v29 }
 0x113   :  { %v118_v32 = vmul.f32 %v114_v27, %v19_v10  ;;  %v1289_v27 = vld [vmem:[%s1612_s2 + $0x78] sm:$0xff] }
 0x114   :  { %v120_v19 = vmul.f32 %v116_v38, %v19_v10 }
 0x115   :  { %v122_v33 = vadd.f32 %v118_v32, %v20_v13 }
 0x116   :  { %v124_v39 = vadd.f32 %v120_v19, %v20_v13  ;;  %v1247_v13 = vld [vmem:[%s1612_s2 + $0x48] sm:$0xff] }
 0x117   :  { %889 = vmatmul.msk.f32.gmra.mxu0 %vm21_vm0, %v122_v33  ;;  %893 = vmatmul.msk.f32.gmra.mxu1 %vm21_vm0, %v122_v33 }
 0x118   :  { %897 = vmatmul.msk.f32.gmra.mxu2 %vm21_vm0, %v122_v33  ;;  %v256_v33 = vld [vmem:[%s1612_s2 + $0x88] sm:$0xff] }
 0x11f   :  { %890 = vmatmul.msk.f32.gmra.mxu0 %vm21_vm0, %v123_v37  ;;  %894 = vmatmul.msk.f32.gmra.mxu1 %vm21_vm0, %v123_v37 }
 0x120   :  { %898 = vmatmul.msk.f32.gmra.mxu2 %vm21_vm0, %v123_v37  ;;  %v257_v37 = vld [vmem:[%s1612_s2 + $0x90] sm:$0xff] }
 0x127   :  { %891 = vmatmul.msk.f32.gmra.mxu0 %vm21_vm0, %v124_v39  ;;  %895 = vmatmul.msk.f32.gmra.mxu1 %vm21_vm0, %v124_v39 }
 0x128   :  { %899 = vmatmul.msk.f32.gmra.mxu2 %vm21_vm0, %v124_v39 }
 0x18b   :  { %v175_v40 = vpop.f32.mrf.mxu0  ;;  %v202_v41 = vpop.f32.mrf.mxu1 }
 0x18c   :  { %v176_v54 = vadd.f32 %v175_v40, %v140_v52  ;;  %v259_v40 = vld [vmem:[%s1612_s2 + $0xa0] sm:$0xff] }
 0x18e   :  { %v272_v62 = vmul.f32 %v1189_v58, %v176_v54  ;;  %v276_v4 = vmul.f32 %v1210_v2, %v176_v54  ;;  %v274_v7 = vmul.f32 %v1219_v5, %v176_v54  ;;  %v278_v10 = vmul.f32 %v1233_v9, %v176_v54 }
 0x18f   :  { %v280_v15 = vmul.f32 %v1247_v13, %v176_v54  ;;  %v282_v21 = vmul.f32 %v1261_v18, %v176_v54  ;;  %v284_v25 = vmul.f32 %v1275_v24, %v176_v54  ;;  %v286_v28 = vmul.f32 %v1289_v27, %v176_v54 }
 0x192   :  { %v229_v42 = vpop.f32.mrf.mxu2 }
 0x193   :  { %v258_v42 = vld [vmem:[%s1612_s2 + $0x98] sm:$0xff] }
 0x194   :  { %v178_v43 = vpop.f32.mrf.mxu0  ;;  %v204_v44 = vpop.f32.mrf.mxu1 }
 0x195   :  { %v179_v55 = vadd.f32 %v178_v43, %v140_v52 }
 0x197   :  { %v275_v63 = vmul.f32 %v1194_v59, %v179_v55  ;;  %v273_v3 = vmul.f32 %v1205_v1, %v179_v55  ;;  %v277_v8 = vmul.f32 %v1224_v6, %v179_v55  ;;  %v279_v12 = vmul.f32 %v1240_v11, %v179_v55 }
 0x198   :  { %v281_v17 = vmul.f32 %v1254_v16, %v179_v55  ;;  %v283_v23 = vmul.f32 %v1268_v22, %v179_v55  ;;  %v285_v26 = vmul.f32 %v1282_v20, %v179_v55  ;;  %v287_v32 = vmul.f32 %v1296_v31, %v179_v55  ;;  %v260_v55 = vld [vmem:[%s1612_s2 + $0xa8] sm:$0xff] }
 0x19b   :  { %v231_v29 = vpop.f32.mrf.mxu2 }
 0x19c   :  { %v181_v45 = vpop.f32.mrf.mxu0  ;;  %v206_v46 = vpop.f32.mrf.mxu1 }
 0x19d   :  { %v207_v56 = vadd.f32 %v206_v46, %v141_v48 }
 0x1a3   :  { %v233_v49 = vpop.f32.mrf.mxu2 }
 0x1a4   :  { %v183_v50 = vpop.f32.mrf.mxu0  ;;  %v209_v51 = vpop.f32.mrf.mxu1  ;;  %v234_v0 = vadd.f32 %v233_v49, %v142_v57 }
 0x1a5   :  { %v210_v53 = vadd.f32 %v209_v51, %v141_v48  ;;  %v265_v51 = vld [vmem:[%s1612_s2 + $0xd0] sm:$0xff] }
 0x1a7   :  { %900 = vmatpush.xpose.msk.msrb.mxu1 %vm21_vm0, %v210_v53  ;;  %939 = vmatpush.xpose.msk.msra.mxu3 %vm21_vm0, %v210_v53 }
 0x1ab   :  { %v236_v60 = vpop.f32.mrf.mxu2  ;;  %901 = vmatpush.xpose.msk.msrb.mxu1 %vm21_vm0, %v207_v56  ;;  %940 = vmatpush.xpose.msk.msra.mxu3 %vm21_vm0, %v207_v56  ;;  %v266_v56 = vld [vmem:[%s1612_s2 + $0xd8] sm:$0xff] }
 0x1ac   :  { %v237_v61 = vadd.f32 %v236_v60, %v142_v57 }
 0x1ae   :  { %646 = vmatpush.msrb.mxu0 %v237_v61  ;;  %941 = vmatpush.msrb.mxu2 %v237_v61 }
 0x1af   :  { %902 = vmatmul.msk.f32.vlgmr.msrb.gmra.mxu1 %vm21_vm0, %v272_v62  ;;  %905 = vmatmul.msk.f32.vlgmr.msra.gmra.mxu3 %vm21_vm0, %v275_v63 }
 0x1b0   :  { %647 = vmatpush.msrb.mxu0 %v234_v0  ;;  %942 = vmatpush.msrb.mxu2 %v234_v0  ;;  %v261_v0 = vld [vmem:[%s1612_s2 + $0xb0] sm:$0xff] }
 0x1b7   :  { %903 = vmatmul.msk.f32.gmra.mxu1 %vm21_vm0, %v273_v3  ;;  %906 = vmatmul.msk.f32.gmra.mxu3 %vm21_vm0, %v276_v4  ;;  %v267_v3 = vld [vmem:[%s1612_s2 + $0xe0] sm:$0xff] }
 0x1bf   :  { %904 = vmatmul.msk.f32.gmra.mxu1 %vm21_vm0, %v274_v7  ;;  %907 = vmatmul.msk.f32.gmra.mxu3 %vm21_vm0, %v277_v8 }
 0x1c7   :  { %908 = vmatmul.msk.f32.gmra.mxu3 %vm21_vm0, %v278_v10 }
 0x1cf   :  { %909 = vmatmul.msk.f32.gmra.mxu3 %vm21_vm0, %v279_v12 }
 0x1d7   :  { %910 = vmatmul.msk.f32.gmra.mxu3 %vm21_vm0, %v280_v15  ;;  %v262_v15 = vld [vmem:[%s1612_s2 + $0xb8] sm:$0xff] }
 0x1df   :  { %911 = vmatmul.msk.f32.gmra.mxu3 %vm21_vm0, %v281_v17  ;;  %v268_v17 = vld [vmem:[%s1612_s2 + $0xe8] sm:$0xff] }
 0x1e7   :  { %912 = vmatmul.msk.f32.gmra.mxu3 %vm21_vm0, %v282_v21 }
 0x1ef   :  { %913 = vmatmul.msk.f32.gmra.mxu3 %vm21_vm0, %v283_v23 }
 0x1f7   :  { %914 = vmatmul.msk.f32.gmra.mxu3 %vm21_vm0, %v284_v25 }
 0x1ff   :  { %915 = vmatmul.msk.f32.gmra.mxu3 %vm21_vm0, %v285_v26 }
 0x207   :  { %916 = vmatmul.msk.f32.gmra.mxu3 %vm21_vm0, %v286_v28 }
 0x20f   :  { %917 = vmatmul.msk.f32.gmra.mxu3 %vm21_vm0, %v287_v32  ;;  %v263_v32 = vld [vmem:[%s1612_s2 + $0xc0] sm:$0xff] }
 0x22c   :  { %v359_v34 = vpop.f32.mrf.mxu1 }
 0x22d   :  { %v1303_v35 = vadd.f32 %v359_v34, %v256_v33  ;;  %v269_v33 = vld [vmem:[%s1612_s2 + $0xf0] sm:$0xff] }
 0x22f   :  { %v408_v36 = vsel %vm407_vm14, %v1303_v35, -inf }
 0x230   :  { %409 = vmax.xlane.f32.xlu2 %v408_v36 }
 0x232   :  { %v368_v30 = vpop.f32.mrf.mxu3 }
 0x233   :  { %v1320_v43 = vadd.f32 %v368_v30, %v259_v40  ;;  %v270_v40 = vld [vmem:[%s1612_s2 + $0xf8] sm:$0xff] }
 0x234   :  { %v362_v38 = vpop.f32.mrf.mxu1 }
 0x235   :  { %v1310_v19 = vadd.f32 %v362_v38, %v257_v37  ;;  %v417_v46 = vsel %vm407_vm14, %v1320_v43, -inf }
 0x237   :  { %v411_v39 = vsel %vm407_vm14, %v1310_v19, -inf }
 0x238   :  { %412 = vmax.xlane.f32.xlu0 %v411_v39  ;;  %v264_v39 = vld [vmem:[%s1612_s2 + $0xc8] sm:$0xff] }
 0x23a   :  { %v371_v41 = vpop.f32.mrf.mxu3 }
 0x23b   :  { %v1341_v57 = vadd.f32 %v371_v41, %v260_v55 }
 0x23c   :  { %v365_v44 = vpop.f32.mrf.mxu1 }
 0x23d   :  { %v1322_v29 = vadd.f32 %v365_v44, %v258_v42  ;;  %v420_v63 = vsel %vm407_vm14, %v1341_v57, -inf }
 0x23f   :  { %v414_v45 = vsel %vm407_vm14, %v1322_v29, -inf }
 0x240   :  { %415 = vmax.xlane.f32.xlu1 %v414_v45  ;;  %418 = vmax.xlane.f32.xlu0 %v417_v46 }
 0x242   :  { %v374_v47 = vpop.f32.mrf.mxu3 }
 0x243   :  { %v1355_v4 = vadd.f32 %v374_v47, %v261_v0  ;;  %v271_v47 = vld [vmem:[%s1612_s2 + $0x100] sm:$0xff] }
 0x245   :  { %v423_v10 = vsel %vm407_vm14, %v1355_v4, -inf }
 0x24a   :  { %v377_v48 = vpop.f32.mrf.mxu3 }
 0x24b   :  { %v1369_v21 = vadd.f32 %v377_v48, %v262_v15 }
 0x24d   :  { %v426_v26 = vsel %vm407_vm14, %v1369_v21, -inf }
 0x252   :  { %v380_v49 = vpop.f32.mrf.mxu3 }
 0x253   :  { %v1383_v34 = vadd.f32 %v380_v49, %v263_v32 }
 0x255   :  { %v429_v38 = vsel %vm407_vm14, %v1383_v34, -inf }
 0x25a   :  { %v383_v50 = vpop.f32.mrf.mxu3 }
 0x25b   :  { %v1397_v41 = vadd.f32 %v383_v50, %v264_v39 }
 0x25d   :  { %v432_v46 = vsel %vm407_vm14, %v1397_v41, -inf }
 0x262   :  { %v386_v52 = vpop.f32.mrf.mxu3 }
 0x263   :  { %v1331_v53 = vadd.f32 %v386_v52, %v265_v51 }
 0x265   :  { %v435_v54 = vsel %vm407_vm14, %v1331_v53, -inf }
 0x266   :  { %436 = vmax.xlane.f32.xlu2 %v435_v54 }
 0x26a   :  { %v389_v60 = vpop.f32.mrf.mxu3 }
 0x26b   :  { %v1343_v61 = vadd.f32 %v389_v60, %v266_v56 }
 0x26d   :  { %v438_v62 = vsel %vm407_vm14, %v1343_v61, -inf }
 0x26e   :  { %439 = vmax.xlane.f32.xlu1 %v438_v62  ;;  %421 = vmax.xlane.f32.xlu2 %v420_v63 }
 0x272   :  { %v392_v7 = vpop.f32.mrf.mxu3 }
 0x273   :  { %v1357_v8 = vadd.f32 %v392_v7, %v267_v3 }
 0x275   :  { %v441_v12 = vsel %vm407_vm14, %v1357_v8, -inf }
 0x276   :  { %424 = vmax.xlane.f32.xlu1 %v423_v10  ;;  %442 = vmax.xlane.f32.xlu0 %v441_v12 }
 0x27a   :  { %v395_v23 = vpop.f32.mrf.mxu3 }
 0x27b   :  { %v1371_v25 = vadd.f32 %v395_v23, %v268_v17 }
 0x27d   :  { %v444_v28 = vsel %vm407_vm14, %v1371_v25, -inf }
 0x27e   :  { %427 = vmax.xlane.f32.xlu0 %v426_v26  ;;  %445 = vmax.xlane.f32.xlu2 %v444_v28 }
 0x282   :  { %v398_v36 = vpop.f32.mrf.mxu3 }
 0x283   :  { %v1385_v30 = vadd.f32 %v398_v36, %v269_v33 }
 0x285   :  { %v447_v37 = vsel %vm407_vm14, %v1385_v30, -inf }
 0x286   :  { %448 = vmax.xlane.f32.xlu1 %v447_v37  ;;  %430 = vmax.xlane.f32.xlu0 %v429_v38 }
 0x28a   :  { %v401_v42 = vpop.f32.mrf.mxu3 }
 0x28b   :  { %v1399_v44 = vadd.f32 %v401_v42, %v270_v40 }
 0x28d   :  { %v450_v45 = vsel %vm407_vm14, %v1399_v44, -inf }
 0x28e   :  { %451 = vmax.xlane.f32.xlu1 %v450_v45  ;;  %433 = vmax.xlane.f32.xlu0 %v432_v46 }
 0x292   :  { %v404_v48 = vpop.f32.mrf.mxu3 }
 0x293   :  { %v1408_v49 = vadd.f32 %v404_v48, %v271_v47 }
 0x295   :  { %v453_v50 = vsel %vm407_vm14, %v1408_v49, -inf }
 0x296   :  { %454 = vmax.xlane.f32.xlu1 %v453_v50 }
 0x2a3   :  { %v410_v51 = vpop.xlane.xlu2 %409 }
 0x2a4   :  { %v456_v52 = vsub.f32 %v1303_v35, %v410_v51 }
 0x2a6   :  { %v472_v54 = vmul.f32 1.442695, %v456_v52 }
 0x2a8   :  { %955 = vpow2.f32 %v472_v54 }
 0x2ab   :  { %v413_v55 = vpop.xlane.xlu0 %412 }
 0x2ac   :  { %v457_v56 = vsub.f32 %v1310_v19, %v413_v55 }
 0x2ae   :  { %v1414_v60 = vpop.eup %955  ;;  %v474_v62 = vmul.f32 1.442695, %v457_v56 }
 0x2af   :  { %v504_v63 = vsel %vm407_vm14, %v1414_v60, 0.0 }
 0x2b0   :  { %957 = vpow2.f32 %v474_v62  ;;  %505 = vadd.xlane.f32.xlu2 %v504_v63 }
 0x2b3   :  { %v416_v0 = vpop.xlane.xlu1 %415  ;;  %v419_v3 = vpop.xlane.xlu0 %418 }
 0x2b4   :  { %v458_v7 = vsub.f32 %v1322_v29, %v416_v0  ;;  %v459_v10 = vsub.f32 %v1320_v43, %v419_v3 }
 0x2b6   :  { %v1420_v35 = vpop.eup %957  ;;  %v476_v12 = vmul.f32 1.442695, %v458_v7  ;;  %v478_v15 = vmul.f32 1.442695, %v459_v10 }
 0x2b7   :  { %v507_v19 = vsel %vm407_vm14, %v1420_v35, 0.0 }
 0x2b8   :  { %959 = vpow2.f32 %v476_v12  ;;  %508 = vadd.xlane.f32.xlu2 %v507_v19 }
 0x2b9   :  { %961 = vpow2.f32 %v478_v15 }
 0x2be   :  { %v1424_v17 = vpop.eup %959 }
 0x2bf   :  { %v1426_v23 = vpop.eup %961  ;;  %v510_v26 = vsel %vm407_vm14, %v1424_v17, 0.0 }
 0x2c0   :  { %v513_v43 = vsel %vm407_vm14, %v1426_v23, 0.0  ;;  %511 = vadd.xlane.f32.xlu2 %v510_v26 }
 0x2c1   :  { %514 = vadd.xlane.f32.xlu1 %v513_v43 }
 0x2d9   :  { %v437_v29 = vpop.xlane.xlu2 %436 }
 0x2da   :  { %v465_v28 = vsub.f32 %v1331_v53, %v437_v29 }
 0x2dc   :  { %v490_v32 = vmul.f32 1.442695, %v465_v28 }
 0x2de   :  { %963 = vpow2.f32 %v490_v32 }
 0x2e1   :  { %v440_v33 = vpop.xlane.xlu1 %439  ;;  %v422_v36 = vpop.xlane.xlu2 %421 }
 0x2e2   :  { %v466_v37 = vsub.f32 %v1343_v61, %v440_v33  ;;  %v460_v38 = vsub.f32 %v1341_v57, %v422_v36 }
 0x2e4   :  { %v1435_v39 = vpop.eup %963  ;;  %v492_v40 = vmul.f32 1.442695, %v466_v37  ;;  %v480_v42 = vmul.f32 1.442695, %v460_v38 }
 0x2e5   :  { %v531_v45 = vsel %vm407_vm14, %v1435_v39, 0.0 }
 0x2e6   :  { %965 = vpow2.f32 %v492_v40  ;;  %532 = vadd.xlane.f32.xlu0 %v531_v45 }
 0x2e7   :  { %967 = vpow2.f32 %v480_v42 }
 0x2e9   :  { %v425_v46 = vpop.xlane.xlu1 %424  ;;  %v443_v53 = vpop.xlane.xlu0 %442 }
 0x2ea   :  { %v461_v47 = vsub.f32 %v1355_v4, %v425_v46  ;;  %v467_v48 = vsub.f32 %v1357_v8, %v443_v53 }
 0x2ec   :  { %v1441_v50 = vpop.eup %965  ;;  %v482_v61 = vmul.f32 1.442695, %v461_v47  ;;  %v494_v57 = vmul.f32 1.442695, %v467_v48 }
 0x2ed   :  { %v1443_v51 = vpop.eup %967  ;;  %v534_v52 = vsel %vm407_vm14, %v1441_v50, 0.0 }
 0x2ee   :  { %969 = vpow2.f32 %v482_v61  ;;  %535 = vadd.xlane.f32.xlu2 %v534_v52  ;;  %v516_v54 = vsel %vm407_vm14, %v1443_v51, 0.0 }
 0x2ef   :  { %971 = vpow2.f32 %v494_v57  ;;  %517 = vadd.xlane.f32.xlu0 %v516_v54 }
 0x2f1   :  { %v428_v55 = vpop.xlane.xlu0 %427  ;;  %v446_v4 = vpop.xlane.xlu2 %445 }
 0x2f2   :  { %v462_v8 = vsub.f32 %v1369_v21, %v428_v55  ;;  %v468_v56 = vsub.f32 %v1371_v25, %v446_v4 }
 0x2f4   :  { %v1451_v62 = vpop.eup %969  ;;  %v484_v63 = vmul.f32 1.442695, %v462_v8  ;;  %v496_v0 = vmul.f32 1.442695, %v468_v56 }
 0x2f5   :  { %v1453_v3 = vpop.eup %971  ;;  %v519_v7 = vsel %vm407_vm14, %v1451_v62, 0.0 }
 0x2f6   :  { %973 = vpow2.f32 %v484_v63  ;;  %v537_v10 = vsel %vm407_vm14, %v1453_v3, 0.0  ;;  %520 = vadd.xlane.f32.xlu2 %v519_v7 }
 0x2f7   :  { %975 = vpow2.f32 %v496_v0  ;;  %538 = vadd.xlane.f32.xlu1 %v537_v10 }
 0x2f9   :  { %v449_v12 = vpop.xlane.xlu1 %448  ;;  %v431_v21 = vpop.xlane.xlu0 %430 }
 0x2fa   :  { %v469_v25 = vsub.f32 %v1385_v30, %v449_v12  ;;  %v463_v15 = vsub.f32 %v1383_v34, %v431_v21 }
 0x2fc   :  { %v1461_v19 = vpop.eup %973  ;;  %v498_v26 = vmul.f32 1.442695, %v469_v25  ;;  %v486_v43 = vmul.f32 1.442695, %v463_v15 }
 0x2fd   :  { %v1463_v29 = vpop.eup %975  ;;  %v522_v28 = vsel %vm407_vm14, %v1461_v19, 0.0 }
 0x2fe   :  { %977 = vpow2.f32 %v498_v26  ;;  %v540_v32 = vsel %vm407_vm14, %v1463_v29, 0.0 }
 0x2ff   :  { %979 = vpow2.f32 %v486_v43  ;;  %523 = vadd.xlane.f32.xlu1 %v522_v28  ;;  %541 = vadd.xlane.f32.xlu0 %v540_v32 }
 0x301   :  { %v452_v33 = vpop.xlane.xlu1 %451  ;;  %v434_v30 = vpop.xlane.xlu0 %433 }
 0x302   :  { %v470_v34 = vsub.f32 %v1399_v44, %v452_v33  ;;  %v464_v36 = vsub.f32 %v1397_v41, %v434_v30 }
 0x304   :  { %v1471_v37 = vpop.eup %977  ;;  %v500_v38 = vmul.f32 1.442695, %v470_v34  ;;  %v488_v40 = vmul.f32 1.442695, %v464_v36 }
 0x305   :  { %v1473_v42 = vpop.eup %979  ;;  %v543_v45 = vsel %vm407_vm14, %v1471_v37, 0.0 }
 0x306   :  { %981 = vpow2.f32 %v500_v38  ;;  %544 = vadd.xlane.f32.xlu2 %v543_v45  ;;  %v525_v46 = vsel %vm407_vm14, %v1473_v42, 0.0 }
 0x307   :  { %983 = vpow2.f32 %v488_v40  ;;  %526 = vadd.xlane.f32.xlu0 %v525_v46 }
 0x309   :  { %v455_v53 = vpop.xlane.xlu1 %454 }
 0x30a   :  { %v471_v44 = vsub.f32 %v1408_v49, %v455_v53 }
 0x30c   :  { %v1480_v41 = vpop.eup %981  ;;  %v502_v47 = vmul.f32 1.442695, %v471_v44 }
 0x30d   :  { %v1482_v48 = vpop.eup %983  ;;  %v546_v61 = vsel %vm407_vm14, %v1480_v41, 0.0 }
 0x30e   :  { %985 = vpow2.f32 %v502_v47  ;;  %547 = vadd.xlane.f32.xlu1 %v546_v61  ;;  %v528_v57 = vsel %vm407_vm14, %v1482_v48, 0.0 }
 0x30f   :  { %529 = vadd.xlane.f32.xlu2 %v528_v57 }
 0x314   :  { %v1488_v52 = vpop.eup %985 }
 0x315   :  { %v549_v54 = vsel %vm407_vm14, %v1488_v52, 0.0 }
 0x316   :  { %550 = vadd.xlane.f32.xlu0 %v549_v54 }
 0x323   :  { %v506_v49 = vpop.xlane.xlu2 %505 }
 0x324   :  { %987 = vrcp.f32 %v506_v49 }
 0x32a   :  { %v988_v55 = vpop.eup %987 }
 0x32b   :  { %v509_v4 = vpop.xlane.xlu2 %508  ;;  %v568_v8 = vmul.f32 %v988_v55, %v1414_v60 }
 0x32c   :  { %989 = vrcp.f32 %v509_v4 }
 0x32d   :  { %918 = vmatmul.msk.f32.vlgmr.msrb.gmra.mxu0 %vm407_vm14, %v568_v8 }
 0x332   :  { %v990_v56 = vpop.eup %989 }
 0x333   :  { %v512_v63 = vpop.xlane.xlu2 %511  ;;  %v569_v0 = vmul.f32 %v990_v56, %v1420_v35 }
 0x334   :  { %991 = vrcp.f32 %v512_v63  ;;  %v515_v7 = vpop.xlane.xlu1 %514 }
 0x335   :  { %919 = vmatmul.msk.f32.gmra.mxu0 %vm407_vm14, %v569_v0  ;;  %993 = vrcp.f32 %v515_v7 }
 0x33a   :  { %v992_v10 = vpop.eup %991 }
 0x33b   :  { %v570_v12 = vmul.f32 %v992_v10, %v1424_v17  ;;  %v994_v21 = vpop.eup %993 }
 0x33c   :  { %v571_v60 = vmul.f32 %v994_v21, %v1426_v23 }
 0x33d   :  { %920 = vmatmul.msk.f32.gmra.mxu0 %vm407_vm14, %v570_v12 }
 0x345   :  { %921 = vmatmul.msk.f32.gmra.mxu0 %vm407_vm14, %v571_v60  ;;  %v729_v60 = vld [vmem:[%s1611_s1 + $0x78] sm:$0xff] }
 0x359   :  { %v533_v25 = vpop.xlane.xlu0 %532 }
 0x35a   :  { %995 = vrcp.f32 %v533_v25 }
 0x360   :  { %v996_v15 = vpop.eup %995 }
 0x361   :  { %v536_v26 = vpop.xlane.xlu2 %535  ;;  %v577_v35 = vmul.f32 %v996_v15, %v1435_v39  ;;  %v727_v15 = vld [vmem:[%s1611_s1 + $0x18] sm:$0xff] }
 0x362   :  { %v518_v43 = vpop.xlane.xlu0 %517  ;;  %997 = vrcp.f32 %v536_v26 }
 0x363   :  { %999 = vrcp.f32 %v518_v43  ;;  %927 = vmatmul.msk.f32.vlgmr.msrb.gmra.mxu2 %vm407_vm14, %v577_v35 }
 0x368   :  { %v998_v28 = vpop.eup %997 }
 0x369   :  { %v1000_v17 = vpop.eup %999  ;;  %v521_v32 = vpop.xlane.xlu2 %520  ;;  %v578_v33 = vmul.f32 %v998_v28, %v1441_v50 }
 0x36a   :  { %v539_v30 = vpop.xlane.xlu1 %538  ;;  %1001 = vrcp.f32 %v521_v32  ;;  %v572_v23 = vmul.f32 %v1000_v17, %v1443_v51 }
 0x36b   :  { %1003 = vrcp.f32 %v539_v30  ;;  %928 = vmatmul.msk.f32.gmra.mxu2 %vm407_vm14, %v578_v33 }
 0x36c   :  { %922 = vmatmul.msk.f32.gmra.mxu0 %vm407_vm14, %v572_v23 }
 0x370   :  { %v1002_v39 = vpop.eup %1001 }
 0x371   :  { %v1004_v34 = vpop.eup %1003  ;;  %v573_v36 = vmul.f32 %v1002_v39, %v1451_v62 }
 0x372   :  { %v524_v38 = vpop.xlane.xlu1 %523  ;;  %v542_v40 = vpop.xlane.xlu0 %541  ;;  %v579_v45 = vmul.f32 %v1004_v34, %v1453_v3 }
 0x373   :  { %1005 = vrcp.f32 %v524_v38 }
 0x374   :  { %1007 = vrcp.f32 %v542_v40  ;;  %923 = vmatmul.msk.f32.gmra.mxu0 %vm407_vm14, %v573_v36  ;;  %929 = vmatmul.msk.f32.gmra.mxu2 %vm407_vm14, %v579_v45 }
 0x379   :  { %v1006_v50 = vpop.eup %1005  ;;  %v545_v51 = vpop.xlane.xlu2 %544 }
 0x37a   :  { %v1008_v46 = vpop.eup %1007  ;;  %v527_v53 = vpop.xlane.xlu0 %526  ;;  %1009 = vrcp.f32 %v545_v51  ;;  %v574_v44 = vmul.f32 %v1006_v50, %v1461_v19 }
 0x37b   :  { %1011 = vrcp.f32 %v527_v53  ;;  %v580_v62 = vmul.f32 %v1008_v46, %v1463_v29 }
 0x37c   :  { %924 = vmatmul.msk.f32.gmra.mxu0 %vm407_vm14, %v574_v44 }
 0x37d   :  { %930 = vmatmul.msk.f32.gmra.mxu2 %vm407_vm14, %v580_v62 }
 0x380   :  { %v1010_v3 = vpop.eup %1009 }
 0x381   :  { %v1012_v47 = vpop.eup %1011  ;;  %v548_v61 = vpop.xlane.xlu1 %547  ;;  %v581_v57 = vmul.f32 %v1010_v3, %v1471_v37 }
 0x382   :  { %1013 = vrcp.f32 %v548_v61  ;;  %v530_v54 = vpop.xlane.xlu2 %529  ;;  %v575_v49 = vmul.f32 %v1012_v47, %v1473_v42 }
 0x383   :  { %1015 = vrcp.f32 %v530_v54 }
 0x384   :  { %925 = vmatmul.msk.f32.gmra.mxu0 %vm407_vm14, %v575_v49 }
 0x385   :  { %931 = vmatmul.msk.f32.gmra.mxu2 %vm407_vm14, %v581_v57 }
 0x388   :  { %v1014_v19 = vpop.eup %1013 }
 0x389   :  { %v1016_v29 = vpop.eup %1015  ;;  %v551_v55 = vpop.xlane.xlu0 %550  ;;  %v582_v4 = vmul.f32 %v1014_v19, %v1480_v41 }
 0x38a   :  { %1017 = vrcp.f32 %v551_v55  ;;  %v576_v8 = vmul.f32 %v1016_v29, %v1482_v48  ;;  %v730_v48 = vld [vmem:[%s1611_s1 + $0xa8] sm:$0xff]  ;;  %v1022_v29 = vld [vmem:[%s1610_s0] sm:$0xff] }
 0x38b   :  { %750 = vmatpush.msra.mxu1 %v730_v48  ;;  %v796_v48 = vld [vmem:[%s1611_s1 + $0xb8] sm:$0xff] }
 0x38c   :  { %926 = vmatmul.msk.f32.gmra.mxu0 %vm407_vm14, %v576_v8 }
 0x38d   :  { %932 = vmatmul.msk.f32.gmra.mxu2 %vm407_vm14, %v582_v4  ;;  %751 = vmatpush.msra.mxu1 %v729_v60  ;;  %v239_v4 = vld [vmem:[%s1612_s2] sm:$0x3] }
 0x390   :  { %v1018_v37 = vpop.eup %1017 }
 0x391   :  { %v583_v42 = vmul.f32 %v1018_v37, %v1488_v52  ;;  %v728_v52 = vld [vmem:[%s1611_s1 + $0x48] sm:$0xff] }
 0x392   :  { %752 = vmatpush.msra.mxu1 %v728_v52 }
 0x394   :  { %753 = vmatpush.msra.mxu1 %v727_v15 }
 0x395   :  { %933 = vmatmul.msk.f32.gmra.mxu2 %vm407_vm14, %v583_v42 }
 0x396   :  { %862 = vmatpush.msrb.mxu1 %v796_v48 }
 0x3aa   :  { %v649_v56 = vpop.f32.mrf.mxu0 }
 0x3ab   :  { %v697_v39 = vmul.f32 %v649_v56, %v1189_v58 }
 0x3b2   :  { %v652_v63 = vpop.f32.mrf.mxu0 }
 0x3ba   :  { %v655_v0 = vpop.f32.mrf.mxu0 }
 0x3bb   :  { %v699_v33 = vmul.f32 %v655_v0, %v1219_v5 }
 0x3bd   :  { %v713_v50 = vadd.f32 %v699_v33, %v697_v39 }
 0x3c2   :  { %v658_v7 = vpop.f32.mrf.mxu0 }
 0x3e6   :  { %v676_v10 = vpop.f32.mrf.mxu2 }
 0x3e9   :  { %v661_v12 = vpop.f32.mrf.mxu0 }
 0x3ea   :  { %v701_v30 = vmul.f32 %v661_v12, %v1210_v2  ;;  %v700_v2 = vmul.f32 %v658_v7, %v1194_v59  ;;  %v790_v12 = vld [vmem:[%s1611_s1 + $0x80] sm:$0xff] }
 0x3ee   :  { %v679_v21 = vpop.f32.mrf.mxu2 }
 0x3ef   :  { %v707_v36 = vmul.f32 %v679_v21, %v1261_v18  ;;  %v698_v18 = vmul.f32 %v652_v63, %v1205_v1  ;;  %v731_v1 = vld [vmem:[%s1611_s1 + $0xd8] ss:$0 sm:$0xff]  ;;  %v789_v21 = vld [vmem:[%s1611_s1 + $0x50] sm:$0xff] }
 0x3f1   :  { %v664_v41 = vpop.f32.mrf.mxu0 }
 0x3f7   :  { %v682_v25 = vpop.f32.mrf.mxu2 }
 0x3f8   :  { %v708_v58 = vmul.f32 %v682_v25, %v1268_v22 }
 0x3f9   :  { %v667_v26 = vpop.f32.mrf.mxu0 }
 0x3fa   :  { %v703_v32 = vmul.f32 %v667_v26, %v1233_v9 }
 0x3fc   :  { %v715_v38 = vadd.f32 %v703_v32, %v701_v30  ;;  %v786_v32 = vld [vmem:[%s1611_s1 + $0xd1] ss:$0 sm:$0xff] }
 0x3fe   :  { %v721_v9 = vadd.f32 %v715_v38, %v713_v50  ;;  %v793_v38 = vld [vmem:[%s1611_s1 + $0x28] sm:$0xff] }
 0x400   :  { %v685_v35 = vpop.f32.mrf.mxu2 }
 0x401   :  { %v670_v43 = vpop.f32.mrf.mxu0  ;;  %v709_v40 = vmul.f32 %v685_v35, %v1275_v24  ;;  %v706_v24 = vmul.f32 %v676_v10, %v1254_v16  ;;  %v791_v10 = vld [vmem:[%s1611_s1 + $0xb0] sm:$0xff] }
 0x402   :  { %v704_v5 = vmul.f32 %v670_v43, %v1240_v11  ;;  %v714_v11 = vadd.f32 %v700_v2, %v698_v18 }
 0x403   :  { %v718_v61 = vadd.f32 %v708_v58, %v706_v24 }
 0x408   :  { %v688_v28 = vpop.f32.mrf.mxu2 }
 0x409   :  { %v673_v17 = vpop.f32.mrf.mxu0  ;;  %v710_v3 = vmul.f32 %v688_v28, %v1282_v20 }
 0x40a   :  { %v705_v23 = vmul.f32 %v673_v17, %v1247_v13  ;;  %v702_v13 = vmul.f32 %v664_v41, %v1224_v6  ;;  %v788_v41 = vld [vmem:[%s1611_s1 + $0x20] sm:$0xff] }
 0x40c   :  { %v717_v51 = vadd.f32 %v707_v36, %v705_v23  ;;  %v794_v36 = vld [vmem:[%s1611_s1 + $0x58] sm:$0xff] }
 0x410   :  { %v691_v34 = vpop.f32.mrf.mxu2 }
 0x411   :  { %v711_v45 = vmul.f32 %v691_v34, %v1289_v27  ;;  %v716_v27 = vadd.f32 %v704_v5, %v702_v13  ;;  %v795_v34 = vld [vmem:[%s1611_s1 + $0x88] sm:$0xff] }
 0x412   :  { %863 = vmatpush.msrb.mxu1 %v795_v34 }
 0x413   :  { %v719_v46 = vadd.f32 %v711_v45, %v709_v40  ;;  %v722_v57 = vadd.f32 %v716_v27, %v714_v11  ;;  %v792_v40 = vld [vmem:[%s1611_s1 + $0xe0] ss:$0 sm:$0xff] }
 0x414   :  { %864 = vmatpush.msrb.mxu1 %v794_v36 }
 0x415   :  { %v723_v53 = vadd.f32 %v719_v46, %v717_v51  ;;  %v797_v46 = vld [vmem:[%s1611_s1 + $0xe8] ss:$0 sm:$0xff] }
 0x416   :  { %865 = vmatpush.msrb.mxu1 %v793_v38 }
 0x417   :  { %v725_v44 = vadd.f32 %v723_v53, %v721_v9 }
 0x418   :  { %v694_v62 = vpop.f32.mrf.mxu2 }
 0x419   :  { %v712_v47 = vmul.f32 %v694_v62, %v1296_v31  ;;  %934 = vmatmul.msk.f32.vlgmr.msra.gmra.mxu1 %vm21_vm0, %v725_v44  ;;  %v1021_v31 = vld [vmem:[%s1610_s0 + $0x8] sm:$0xff] }
 0x41b   :  { %v720_v59 = vadd.f32 %v712_v47, %v710_v3 }
 0x41d   :  { %v724_v6 = vadd.f32 %v720_v59, %v718_v61 }
 0x41f   :  { %v726_v54 = vadd.f32 %v724_v6, %v722_v57 }
 0x421   :  { %935 = vmatmul.msk.f32.gmra.mxu1 %vm21_vm0, %v726_v54 }
 0x496   :  { %v755_v22 = vpop.f32.mrf.mxu1 }
 0x497   :  { %v756_v49 = vadd.f32 %v755_v22, %v731_v1 }
 0x499   :  { %v761_v55 = vadd.f32 %v1022_v29, %v756_v49 }
 0x49e   :  { %v758_v16 = vpop.f32.mrf.mxu1 }
 0x49f   :  { %v759_v20 = vadd.f32 %v758_v16, %v731_v1 }
 0x4a1   :  { %v762_v19 = vadd.f32 %v1021_v31, %v759_v20 }
 0x4a3   :  { %780 = vmatpush.msra.mxu2 %v762_v19 }
 0x4a5   :  { %781 = vmatpush.msra.mxu2 %v761_v55 }
 0x4a6   :  { %936 = vmatmul.msk.f32.vlgmr.msra.gmra.mxu2 %vm407_vm14, %v239_v4 }
 0x4a7   :  { %838 = vmatpush.msrb.mxu2 %v791_v10 }
 0x4a9   :  { %839 = vmatpush.msrb.mxu2 %v790_v12 }
 0x4ab   :  { %840 = vmatpush.msrb.mxu2 %v789_v21 }
 0x4ad   :  { %841 = vmatpush.msrb.mxu2 %v788_v41 }
 0x529   :  { %v783_v8 = vpop.f32.mrf.mxu2 }
 0x52a   :  { %v799_v37 = vsel %vm798_vm15, %v783_v8, 0.0 }
 0x52b   :  { %800 = vadd.xlane.f32.xlu1 %v799_v37 }
 0x59e   :  { %v801_v42 = vpop.xlane.xlu1 %800 }
 0x59f   :  { %v802_v56 = vmul.f32 %v801_v42, %v1087_v14 }
 0x5a1   :  { %v803_v63 = vsub.f32 %v783_v8, %v802_v56 }
 0x5a3   :  { %v804_v0 = vmul.f32 %v803_v63, %v803_v63 }
 0x5a5   :  { %v805_v7 = vsel %vm798_vm15, %v804_v0, 0.0 }
 0x5a6   :  { %806 = vadd.xlane.f32.xlu2 %v805_v7 }
 0x619   :  { %v807_v60 = vpop.xlane.xlu2 %806 }
 0x61a   :  { %v808_v52 = vmul.f32 %v807_v60, %v1087_v14  ;;  %v787_v14 = vld [vmem:[%s1611_s1 + $0xd9] ss:$0 sm:$0xff] }
 0x61c   :  { %v809_v25 = vadd.f32 1e-05, %v808_v52 }
 0x61e   :  { %1019 = vrsqrt.f32 %v809_v25  ;;  %vm816_vm2 = vweird.f32 %v809_v25 }
 0x624   :  { %v1020_v15 = vpop.eup %1019 }
 0x625   :  { %v811_v26 = vmul.f32 %v1020_v15, %v809_v25  ;;  %vm817_vm1 = vweird.f32 %v1020_v15 }
 0x626   :  { %vm818_vm3 = vmor %vm816_vm2, %vm817_vm1 }
 0x627   :  { %v812_v35 = vmul.f32 %v1020_v15, %v811_v26 }
 0x629   :  { %v813_v43 = vmul.f32 0.5, %v812_v35 }
 0x62b   :  { %v814_v28 = vsub.f32 1.5, %v813_v43 }
 0x62d   :  { %v815_v17 = vmul.f32 %v1020_v15, %v814_v28 }
 0x62f   :  { %v819_v33 = vsel %vm818_vm3, %v1020_v15, %v815_v17 }
 0x630   :  { %v820_v30 = vmul.f32 %v819_v33, %v803_v63 }
 0x632   :  { %v821_v23 = vmul.f32 %v820_v30, %v786_v32 }
 0x634   :  { %v822_v39 = vadd.f32 %v821_v23, %v787_v14 }
 0x636   :  { %937 = vmatmul.msk.f32.vlgmr.msrb.gmra.mxu2 %vm21_vm0, %v822_v39 }
 0x6b9   :  { %v843_v45 = vpop.f32.mrf.mxu2 }
 0x6ba   :  { %v844_v50 = vadd.f32 %v843_v45, %v792_v40 }
 0x6bc   :  { %v846_v51 = vmax.f32 %v844_v50, 0.0 }
 0x6be   :  { %938 = vmatmul.msk.f32.vlgmr.msrb.gmra.mxu1 %vm21_vm0, %v846_v51 }
 0x73b   :  { %v867_v9 = vpop.f32.mrf.mxu1 }
 0x73c   :  { %v868_v5 = vadd.f32 %v867_v9, %v797_v46 }
 0x73e   :  { %870 = vst [vmem:[#allocation2] sm:$0x3] %v868_v5 }
 0x73f   :  { %881 = dma.vmem_to_hbm [thread:$0]  %s877_s18, 32, %s879_s21, [#allocation3]  }
 0x740   :  { %1047 = dma.done.wait [#allocation3], 32  }
 0x741   :  { %1048 = vsyncadd [#allocation3], 4294967264 }
 0x742   :  { %886 = vsyncpa [#allocation3], 1 }

</bundles_post_ra>
